<compile_context>
chip_gen: v7x
topology: tpu7x:2x2x1
jax: 0.10.0
libtpu: 0.0.40
codegen_flags: <defaults>
</compile_context>

<pallas_src>
import functools

import jax
import jax.numpy as jnp
from jax.experimental import pallas as pl
from jax.experimental.pallas import tpu as pltpu

LANES = 128
SUBLANES = 8
CHUNK_ROWS = 512                      # (512,128) f32 temporaries = 256 KiB / chunk
TARGET_BLOCK_BYTES = 2 * 1024 * 1024  # ~2 MiB of input bytes per operand per block


def _cdiv(a, b):
    return -(-a // b)


def _round_up(a, b):
    return _cdiv(a, b) * b


def _row_align(dtype):
    # Packed sublane tile: 8 rows for 4-byte, 16 for 2-byte, 32 for 1-byte.
    itemsize = jnp.dtype(dtype).itemsize
    return max(SUBLANES, 32 // max(itemsize, 1))


def _bce_terms(x, t):
    # Numerically stable BCE-with-logits, exactly the PyTorch module's formula:
    #   -x*t + clamp(x, min=0) + log(1 + exp(-|x|))
    x = x.astype(jnp.float32)
    t = t.astype(jnp.float32)
    return -x * t + jnp.maximum(x, 0.0) + jnp.log(1.0 + jnp.exp(-jnp.abs(x)))


def _loss_kernel(x_ref, t_ref, o_ref, *, block_rows, chunk_rows, valid_rows_last):
    """Accumulates the per-element BCE terms of one (block_rows, 128) block
    onto the resident (8, 128) f32 output accumulator."""
    step = pl.program_id(0)
    last = pl.num_programs(0) - 1
    n_chunks = block_rows // chunk_rows

    @pl.when(step == 0)
    def _():
        o_ref[...] = jnp.zeros_like(o_ref)

    def chunk_partial(c, masked):
        if n_chunks == 1:
            xv, tv, base = x_ref[...], t_ref[...], 0
        else:
            r0 = pl.multiple_of(c * chunk_rows, chunk_rows)
            xv = x_ref[pl.ds(r0, chunk_rows), :]
            tv = t_ref[pl.ds(r0, chunk_rows), :]
            base = c * chunk_rows
        val = _bce_terms(xv, tv)
        if masked:
            # Only the (single) partial last block pays for the mask; the
            # threshold is derived from compile-time constants.
            row = jax.lax.broadcasted_iota(jnp.int32, (chunk_rows, LANES), 0)
            val = jnp.where(row < (valid_rows_last - base), val, 0.0)
        # Fold (chunk_rows, 128) onto (8, 128) with pure VPU adds (tile-aligned
        # reshape; lanes stay put, no cross-lane reduce in the hot loop).
        return jnp.sum(val.reshape(chunk_rows // SUBLANES, SUBLANES, LANES), axis=0)

    def block_partial(masked):
        if n_chunks == 1:
            return chunk_partial(0, masked)
        return jax.lax.fori_loop(
            0, n_chunks,
            lambda c, acc: acc + chunk_partial(c, masked),
            jnp.zeros((SUBLANES, LANES), jnp.float32))

    if valid_rows_last == block_rows:
        # Every block is full: mask-free everywhere.
        o_ref[...] += block_partial(masked=False)
    else:
        @pl.when(step != last)
        def _():
            o_ref[...] += block_partial(masked=False)

        @pl.when(step == last)
        def _():
            o_ref[...] += block_partial(masked=True)


@jax.jit
def sigmoid_cross_entropy_loss(x, target):
    """Pallas implementation of SigmoidCrossEntropyLoss.forward(x, target)."""
    assert x.shape == target.shape, "x and target must share a shape"
    total_n = int(x.size)

    flat_x = x.reshape(-1)
    flat_t = target.reshape(-1)

    rows_full = total_n // LANES
    lane_rem = total_n - rows_full * LANES

    # <128 trailing elements (only when N is not lane-aligned): plain-JAX sum.
    tail_sum = jnp.float32(0.0)
    if lane_rem:
        tail_sum = jnp.sum(_bce_terms(flat_x[rows_full * LANES:],
                                      flat_t[rows_full * LANES:]))

    if rows_full == 0:
        total = tail_sum
    else:
        if lane_rem:
            # 128-aligned prefix; no O(N) padding (at worst XLA copies this
            # contiguous prefix once, and the kernel itself stays mask-free).
            flat_x = flat_x[: rows_full * LANES]
            flat_t = flat_t[: rows_full * LANES]
        x2 = flat_x.reshape(rows_full, LANES)  # metadata-only reshape
        t2 = flat_t.reshape(rows_full, LANES)

        itemsize = max(jnp.dtype(x.dtype).itemsize, jnp.dtype(target.dtype).itemsize)
        cap_rows = max(CHUNK_ROWS, TARGET_BLOCK_BYTES // (LANES * itemsize))
        align = max(_row_align(x.dtype), _row_align(target.dtype))
        if rows_full >= CHUNK_ROWS:
            block_rows = min(cap_rows, _round_up(rows_full, CHUNK_ROWS))
            chunk_rows = CHUNK_ROWS
        else:
            block_rows = _round_up(rows_full, align)
            chunk_rows = block_rows
        num_steps = _cdiv(rows_full, block_rows)
        valid_rows_last = rows_full - (num_steps - 1) * block_rows

        kernel = functools.partial(
            _loss_kernel,
            block_rows=block_rows,
            chunk_rows=chunk_rows,
            valid_rows_last=valid_rows_last)

        elems = rows_full * LANES
        cost = pl.CostEstimate(
            flops=8 * elems,
            transcendentals=2 * elems,
            bytes_accessed=(x2.size * x2.dtype.itemsize
                            + t2.size * t2.dtype.itemsize
                            + SUBLANES * LANES * 4))

        partials = pl.pallas_call(
            kernel,
            out_shape=jax.ShapeDtypeStruct((SUBLANES, LANES), jnp.float32),
            grid_spec=pltpu.PrefetchScalarGridSpec(
                num_scalar_prefetch=0,
                grid=(num_steps,),
                in_specs=[
                    pl.BlockSpec((block_rows, LANES), lambda i: (i, 0)),
                    pl.BlockSpec((block_rows, LANES), lambda i: (i, 0)),
                ],
                out_specs=pl.BlockSpec((SUBLANES, LANES), lambda i: (0, 0)),
            ),
            compiler_params=pltpu.CompilerParams(
                dimension_semantics=("arbitrary",),
                vmem_limit_bytes=32 * 1024 * 1024,
            ),
            cost_estimate=cost,
        )(x2, t2)

        total = jnp.sum(partials, dtype=jnp.float32) + tail_sum

    # Plain f32 accumulation across steps; fine for a loss scalar (~1e-4 rel
    # precision even for very large N).
    return jnp.abs(total / jnp.float32(total_n))


if __name__ == "__main__":
    # Small shapes consistent with the module's elementwise forward:
    # x, target: (batch=2, channels=4, spatial=16, 16) -> 2048 elements
    key = jax.random.PRNGKey(0)
    kx, kt = jax.random.split(key)
    x = jax.random.normal(kx, (2, 4, 16, 16), dtype=jnp.float32)
    target = (jax.random.uniform(kt, (2, 4, 16, 16)) > 0.5).astype(jnp.float32)

    loss = sigmoid_cross_entropy_loss(x, target)
    loss = jax.block_until_ready(loss)

    # Pure-JAX reference check (same formula).
    ref = jnp.abs(
        jnp.mean(
            -x * target
            + jnp.maximum(x, 0.0)
            + jnp.log(1.0 + jnp.exp(-jnp.abs(x)))
        )
    )
    assert jnp.allclose(loss, ref, rtol=1e-5, atol=1e-6), (loss, ref)

    # Non-lane-aligned size: exercises the masked last block + plain-JAX tail.
    xb = jax.random.normal(kx, (3, 5, 7, 11), dtype=jnp.float32)  # 1155 elems
    tb = (jax.random.uniform(kt, (3, 5, 7, 11)) > 0.5).astype(jnp.float32)
    loss_b = jax.block_until_ready(sigmoid_cross_entropy_loss(xb, tb))
    ref_b = jnp.abs(
        jnp.mean(
            -xb * tb + jnp.maximum(xb, 0.0) + jnp.log(1.0 + jnp.exp(-jnp.abs(xb)))
        )
    )
    assert jnp.allclose(loss_b, ref_b, rtol=1e-5, atol=1e-6), (loss_b, ref_b)

    print("KERNEL_OK")
</pallas_src>

<mosaic_0001>
module attributes {stable_mosaic.version = 11 : i64} {
  func.func @_loss_kernel(%arg0: i32, %arg1: memref<16x128xf32, #tpu.memory_space<vmem>>, %arg2: memref<16x128xf32, #tpu.memory_space<vmem>>, %arg3: memref<8x128xf32, #tpu.memory_space<vmem>>) attributes {dimension_semantics = [#tpu.dimension_semantics<arbitrary>], iteration_bounds = array<i64: 1>, scalar_prefetch = 0 : i64, scratch_operands = 0 : i64, tpu.core_type = #tpu.core_type<tc>, window_params = [{transform_indices = @transform_0, window_bounds = array<i64: 16, 128>}, {transform_indices = @transform_1, window_bounds = array<i64: 16, 128>}, {pipeline_mode = #tpu.pipeline_mode<synchronous>, transform_indices = @transform_2, window_bounds = array<i64: 8, 128>}]} {
    %c0_i32 = arith.constant 0 : i32
    %0 = arith.cmpi eq, %arg0, %c0_i32 : i32
    %1 = arith.extui %0 : i1 to i32
    %c0_i32_0 = arith.constant 0 : i32
    %2 = arith.cmpi ne, %1, %c0_i32_0 : i32
    scf.if %2 {
      %cst_12 = arith.constant 0.000000e+00 : f32
      %24 = vector.broadcast %cst_12 : f32 to vector<8x128xf32>
      %c0_13 = arith.constant 0 : index
      %c0_14 = arith.constant 0 : index
      %25 = vector.load %arg3[%c0_13, %c0_14] : memref<8x128xf32, #tpu.memory_space<vmem>>, vector<8x128xf32>
      tpu.vector_store %arg3[%c0_13, %c0_14], %24 {strides = array<i32>} : memref<8x128xf32, #tpu.memory_space<vmem>>, vector<8x128xf32>,
    } else {
    }
    %c0 = arith.constant 0 : index
    %c0_1 = arith.constant 0 : index
    %3 = vector.load %arg3[%c0, %c0_1] : memref<8x128xf32, #tpu.memory_space<vmem>>, vector<8x128xf32>
    %c0_2 = arith.constant 0 : index
    %c0_3 = arith.constant 0 : index
    %4 = vector.load %arg1[%c0_2, %c0_3] : memref<16x128xf32, #tpu.memory_space<vmem>>, vector<16x128xf32>
    %c0_4 = arith.constant 0 : index
    %c0_5 = arith.constant 0 : index
    %5 = vector.load %arg2[%c0_4, %c0_5] : memref<16x128xf32, #tpu.memory_space<vmem>>, vector<16x128xf32>
    %cst = arith.constant 0.000000e+00 : f32
    %6 = vector.broadcast %cst : f32 to vector<16x128xf32>
    %7 = arith.subf %6, %4 : vector<16x128xf32>
    %8 = arith.mulf %7, %5 : vector<16x128xf32>
    %cst_6 = arith.constant 0.000000e+00 : f32
    %9 = vector.broadcast %cst_6 : f32 to vector<16x128xf32>
    %10 = arith.maximumf %4, %9 : vector<16x128xf32>
    %11 = arith.addf %8, %10 : vector<16x128xf32>
    %12 = math.absf %4 : vector<16x128xf32>
    %cst_7 = arith.constant 0.000000e+00 : f32
    %13 = vector.broadcast %cst_7 : f32 to vector<16x128xf32>
    %14 = arith.subf %13, %12 : vector<16x128xf32>
    %15 = math.exp %14 : vector<16x128xf32>
    %cst_8 = arith.constant 1.000000e+00 : f32
    %16 = vector.broadcast %cst_8 : f32 to vector<16x128xf32>
    %17 = arith.addf %16, %15 : vector<16x128xf32>
    %18 = math.log %17 : vector<16x128xf32>
    %19 = arith.addf %11, %18 : vector<16x128xf32>
    %20 = vector.shape_cast %19 : vector<16x128xf32> to vector<2x8x128xf32>
    %cst_9 = arith.constant dense<0.000000e+00> : vector<8x128xf32>
    %21 = vector.multi_reduction <add>, %20, %cst_9 [0] : vector<2x8x128xf32> to vector<8x128xf32>
    %22 = arith.addf %3, %21 : vector<8x128xf32>
    %c0_10 = arith.constant 0 : index
    %c0_11 = arith.constant 0 : index
    %23 = vector.load %arg3[%c0_10, %c0_11] : memref<8x128xf32, #tpu.memory_space<vmem>>, vector<8x128xf32>
    tpu.vector_store %arg3[%c0_10, %c0_11], %22 {strides = array<i32>} : memref<8x128xf32, #tpu.memory_space<vmem>>, vector<8x128xf32>,
    return
  }
  func.func @transform_0(%arg0: i32) -> (i32, i32) {
    %c0_i32 = arith.constant 0 : i32
    %c0_i32_0 = arith.constant 0 : i32
    return %arg0, %c0_i32 : i32, i32
  }
  func.func @transform_1(%arg0: i32) -> (i32, i32) {
    %c0_i32 = arith.constant 0 : i32
    %c0_i32_0 = arith.constant 0 : i32
    return %arg0, %c0_i32 : i32, i32
  }
  func.func @transform_2(%arg0: i32) -> (i32, i32) {
    %c0_i32 = arith.constant 0 : i32
    %c0_i32_0 = arith.constant 0 : i32
    %c0_i32_1 = arith.constant 0 : i32
    return %c0_i32, %c0_i32_0 : i32, i32
  }
}

</mosaic_0001>

<bundles_post_ra>
// kernel: sigmoid_cross_entropy_loss.1
= control target key start
LH: loop header
LB: loop body
LE: loop exit
PB: predicated region body
PF: predicated region fallthrough
CT: control target
= control target key end

     0   :  { %s91_s0 = inlined_call_operand.vmem [shape: f32[16,128], index: 0, kind: input, shape index: {}]   ;;  %s92_s1 = inlined_call_operand.vmem [shape: f32[16,128], index: 1, kind: input, shape index: {}]   ;;  %s93_s2 = inlined_call_operand.vmem [shape: f32[8,128], index: 2, kind: output, shape index: {}]  }
   0x1   :  { %v17_v0 = vld [vmem:[%s91_s0] sm:$0xff]  ;;  %v18_v1 = vld [vmem:[%s91_s0 + $0x8] sm:$0xff] }
   0x2   :  { %v29_v2 = vand.u32 2147483647, %v17_v0  ;;  %v30_v3 = vand.u32 2147483647, %v18_v1  ;;  %v21_v12 = vsub.f32 0.0, %v17_v0  ;;  %v19_v13 = vld [vmem:[%s92_s1] sm:$0xff] }
   0x3   :  { %v22_v14 = vsub.f32 0.0, %v18_v1  ;;  %v20_v15 = vld [vmem:[%s92_s1 + $0x8] sm:$0xff]  ;;  %v25_v17 = vmax.f32 %v17_v0, 0.0  ;;  %v26_v19 = vmax.f32 %v18_v1, 0.0 }
   0x4   :  { %v31_v4 = vsub.f32 0.0, %v29_v2  ;;  %v32_v5 = vsub.f32 0.0, %v30_v3  ;;  %v23_v16 = vmul.f32 %v21_v12, %v19_v13 }
   0x5   :  { %v24_v18 = vmul.f32 %v22_v14, %v20_v15 }
   0x6   :  { %v33_v6 = vmul.f32 1.442695, %v31_v4  ;;  %v35_v7 = vmul.f32 1.442695, %v32_v5  ;;  %v27_v20 = vadd.f32 %v25_v17, %v23_v16 }
   0x7   :  { %v28_v22 = vadd.f32 %v26_v19, %v24_v18 }
   0x8   :  { %53 = vpow2.f32 %v33_v6 }
   0x9   :  { %55 = vpow2.f32 %v35_v7 }
  0x12   :  { %v54_v8 = vpop.eup %53 }
  0x13   :  { %v56_v9 = vpop.eup %55  ;;  %v37_v10 = vadd.f32 1.0, %v54_v8 }
  0x14   :  { %v38_v11 = vadd.f32 1.0, %v56_v9 }
  0x15   :  { %57 = vlog2.f32 %v37_v10 }
  0x16   :  { %59 = vlog2.f32 %v38_v11 }
  0x1f   :  { %v58_v21 = vpop.eup %57 }
  0x20   :  { %v60_v23 = vpop.eup %59  ;;  %v40_v24 = vmul.f32 0.6931472, %v58_v21 }
  0x21   :  { %v42_v25 = vmul.f32 0.6931472, %v60_v23 }
  0x22   :  { %v43_v26 = vadd.f32 %v40_v24, %v27_v20 }
  0x23   :  { %v44_v27 = vadd.f32 %v42_v25, %v28_v22 }
  0x25   :  { %v45_v28 = vadd.f32 %v44_v27, %v43_v26 }
  0x27   :  { %47 = vst [vmem:[%s93_s2] sm:$0xff] %v45_v28 }

</bundles_post_ra>
